<compile_context>
chip_gen: v5e
topology: v5e:2x2
jax: 0.10.0
libtpu: 0.0.40
codegen_flags: <defaults>
</compile_context>

<pallas_src>
import jax
import jax.numpy as jnp
import numpy as np
from jax import lax
from jax.experimental import pallas as pl
from jax.experimental.pallas import tpu as pltpu

_VMEM = pl.BlockSpec(memory_space=pltpu.MemorySpace.VMEM)
_LANE = 128
_SUBLANE = 8


def _ceil_to(x, m):
    return -(-x // m) * m


# ------------------------------ parameter packing ------------------------------ #

def pack_sc_params(params):
    """Pack every weight/bias into one (rows, width) f32 slab (static layout).

    Per GraphConv layer, W_rel and W_root are stacked into a single (2*in_c, out_c)
    matrix so the kernel can do ONE dot on concat([agg, h], -1).
    The final MLP layer is lane-padded to 128 output columns (zero weights,
    -1e30 bias) so every op on the cluster axis is lane-dense; the padded probs
    columns come out exactly 0 and are sliced away in the wrapper.

    Returns: slab, mp_layout, mlp_layout, c_pad, num_clusters
      layout entries are static tuples (w_row, k, out_c, b_row).
    """
    mp, mlp = params["mp"], params["mlp"]
    num_clusters = mlp[-1][0].shape[1]
    c_pad = _ceil_to(num_clusters, _LANE)

    width = _ceil_to(
        max([w.shape[1] for (w, _, _) in mp]
            + [w.shape[1] for (w, _) in mlp[:-1]]
            + [c_pad]),
        _LANE)

    pieces, mp_layout, mlp_layout = [], [], []
    row = 0

    def place(arr):
        nonlocal row
        r0 = row
        pieces.append((r0, arr))
        row = _ceil_to(r0 + arr.shape[0], _SUBLANE)   # keep every block sublane-aligned
        return r0

    for (w_rel, b_rel, w_root) in mp:
        w_cat = jnp.concatenate([w_rel, w_root], axis=0)        # (2*in_c, out_c)
        w_row = place(w_cat)
        b_row = place(b_rel)
        mp_layout.append((w_row, w_cat.shape[0], w_cat.shape[1], b_row))

    n_mlp = len(mlp)
    for li, (w, b) in enumerate(mlp):
        if li == n_mlp - 1:                                     # lane-pad cluster dim
            w = jnp.pad(w, ((0, 0), (0, c_pad - w.shape[1])))
            b = jnp.pad(b, ((0, 0), (0, c_pad - b.shape[1])), constant_values=-1e30)
        w_row = place(w)
        b_row = place(b)
        mlp_layout.append((w_row, w.shape[0], w.shape[1], b_row))

    slab = jnp.zeros((_ceil_to(max(row, _SUBLANE), _SUBLANE), width), jnp.float32)
    for r0, arr in pieces:
        slab = slab.at[r0:r0 + arr.shape[0], :arr.shape[1]].set(arr)
    return slab, tuple(mp_layout), tuple(mlp_layout), c_pad, num_clusters


# ------------------------------ fused Pallas kernel ------------------------------ #

def _make_fused_kernel(mp_layout, mlp_layout, mp_act, mlp_act, num_clusters):
    n_mlp = len(mlp_layout)
    inv_sqrt_c = 1.0 / float(np.sqrt(num_clusters))

    def kernel(adj_ref, x_ref, p_ref, probs_ref, mc_ref, o_ref):
        adj_t = adj_ref[...]                   # (N, N) bf16, loaded ONCE, reused everywhere
        h = x_ref[...]                         # (N, F_in) f32

        # ---- GraphConv stack:  h' = act( [A^T h , h] @ [W_rel; W_root] + b_rel ) ----
        for (w_row, k, out_c, b_row) in mp_layout:
            agg = jnp.dot(adj_t, h.astype(jnp.bfloat16),
                          preferred_element_type=jnp.float32)          # bf16 MXU, f32 acc
            cat = jnp.concatenate([agg, h], axis=-1)                   # (N, 2*in_c) f32
            w = p_ref[w_row:w_row + k, :out_c]                         # static slab views
            b = p_ref[b_row:b_row + 1, :out_c]
            h = jnp.dot(cat, w, preferred_element_type=jnp.float32) + b
            if mp_act == "relu":
                h = jnp.maximum(h, 0.0)

        # ---- MLP -> cluster logits (last layer lane-padded; pad bias = -1e30) ----
        s = h
        for li, (w_row, k, out_c, b_row) in enumerate(mlp_layout):
            w = p_ref[w_row:w_row + k, :out_c]
            b = p_ref[b_row:b_row + 1, :out_c]
            s = jnp.dot(s, w, preferred_element_type=jnp.float32) + b
            if li < n_mlp - 1 and mlp_act == "relu":
                s = jnp.maximum(s, 0.0)

        # ---- softmax over clusters (padded logits -1e30 -> exp underflows to 0) ----
        m = jnp.max(s, axis=-1, keepdims=True)
        e = jnp.exp(s - m)
        denom = jnp.sum(e, axis=-1, keepdims=True)
        r = pl.reciprocal(denom, approx=True)        # EUP slot
        r = r * (2.0 - denom * r)                    # one Newton step -> ~f32-exact rows
        probs = e * r                                # (N, c_pad), padded cols exactly 0
        probs_ref[...] = probs

        # ---- mincut loss:  -tr(S^T A S) / tr(S^T D S) ----
        a_s = jnp.dot(adj_t, probs.astype(jnp.bfloat16),
                      preferred_element_type=jnp.float32)              # (N, c_pad)
        mincut_num = jnp.sum(probs * a_s)                              # tr(S^T A S)
        p2 = jnp.sum(probs * probs, axis=-1, keepdims=True)            # (N, 1) = ||S_i||^2
        # tr(S^T D S) = sum_i deg_i ||S_i||^2 = 1^T (A^T @ p2)   (deg derived in-kernel)
        mincut_den = jnp.sum(jnp.dot(adj_t, p2.astype(jnp.bfloat16),
                                     preferred_element_type=jnp.float32))
        mc = -(mincut_num / mincut_den)

        # ---- ortho loss (analytic, no identity materialization):
        #      X = S^T S / ||S^T S||_F ;  ||X - I/sqrt(C)||_F = sqrt(2 - 2 tr(X)/sqrt(C))
        ss = lax.dot_general(probs, probs, (((0,), (0,)), ((), ())),
                             preferred_element_type=jnp.float32)       # (c_pad, c_pad)
        ss_fro = jnp.sqrt(jnp.sum(ss * ss))
        tr_ss = jnp.sum(p2)                                            # tr(S^T S)
        o = jnp.sqrt(jnp.maximum(2.0 - 2.0 * (tr_ss / ss_fro) * inv_sqrt_c, 0.0))

        mc_ref[...] = jnp.full((1, 1), mc, dtype=jnp.float32)
        o_ref[...] = jnp.full((1, 1), o, dtype=jnp.float32)

    return kernel


# ------------------------------ wrapper (single pallas_call) ------------------------------ #

def dense_adj_t(edge_index, edge_weight, num_nodes):
    """to_dense_adj, built already transposed: adj_t[dst, src] += w (duplicates summed)."""
    return (jnp.zeros((num_nodes, num_nodes), jnp.float32)
            .at[edge_index[1], edge_index[0]].add(edge_weight))


def sc_layer_forward(params, x, edge_index, edge_weight,
                     *, mp_act="relu", mlp_act="relu"):
    n = x.shape[0]
    # bf16 storage for the only O(N^2) operand (HBM traffic / VMEM footprint halved);
    # all accumulation inside the kernel is f32.
    adj_t = dense_adj_t(edge_index, edge_weight, n).astype(jnp.bfloat16)
    slab, mp_layout, mlp_layout, c_pad, num_clusters = pack_sc_params(params)

    kernel = _make_fused_kernel(mp_layout, mlp_layout, mp_act, mlp_act, num_clusters)
    probs_pad, mc, o = pl.pallas_call(
        kernel,
        out_shape=(jax.ShapeDtypeStruct((n, c_pad), jnp.float32),
                   jax.ShapeDtypeStruct((1, 1), jnp.float32),
                   jax.ShapeDtypeStruct((1, 1), jnp.float32)),
        in_specs=[_VMEM, _VMEM, _VMEM],                       # adj_t, x, param slab
        out_specs=(_VMEM, _VMEM, _VMEM),
        compiler_params=pltpu.CompilerParams(
            # Tiny footprint here; 32 MiB is within every generation's scoped budget
            # (v7x: 64 MiB/TC physical).  Re-derive per generation once row-tiled.
            vmem_limit_bytes=32 * 1024 * 1024),
    )(adj_t, x.astype(jnp.float32), slab)
    return probs_pad[:, :num_clusters], mc[0, 0], o[0, 0]


# ------------------------------ parameters ------------------------------ #

def _init_linear(key, fan_in, fan_out):
    """PyTorch nn.Linear default init: U(-1/sqrt(fan_in), 1/sqrt(fan_in))."""
    kw, kb = jax.random.split(key)
    bound = 1.0 / np.sqrt(fan_in)
    w = jax.random.uniform(kw, (fan_in, fan_out), jnp.float32, -bound, bound)
    b = jax.random.uniform(kb, (1, fan_out), jnp.float32, -bound, bound)
    return w, b


def init_sc_layer_params(key, dim_in, mp_units, mlp_units, num_clusters):
    params = {"mp": [], "mlp": []}
    in_c = dim_in
    for units in mp_units:
        key, k_rel, k_root = jax.random.split(key, 3)
        w_rel, b_rel = _init_linear(k_rel, in_c, units)    # lin_rel (with bias)
        w_root, _ = _init_linear(k_root, in_c, units)      # lin_root (no bias)
        params["mp"].append((w_rel, b_rel, w_root))
        in_c = units
    out_c = mp_units[-1]
    for units in list(mlp_units) + [num_clusters]:
        key, k = jax.random.split(key)
        params["mlp"].append(_init_linear(k, out_c, units))
        out_c = units
    return params


# ------------------------------ pure-JAX f32 reference (the spec) ------------------------------ #

def dense_adj(edge_index, edge_weight, num_nodes):
    return (jnp.zeros((num_nodes, num_nodes), jnp.float32)
            .at[edge_index[0], edge_index[1]].add(edge_weight))


def sc_layer_reference(params, x, edge_index, edge_weight,
                       *, mp_act="relu", mlp_act="relu"):
    n = x.shape[0]
    adj = dense_adj(edge_index, edge_weight, n)
    h = x.astype(jnp.float32)
    for (w_rel, b_rel, w_root) in params["mp"]:
        h = (adj.T @ h) @ w_rel + b_rel + h @ w_root
        if mp_act == "relu":
            h = jnp.maximum(h, 0.0)
    s = h
    n_mlp = len(params["mlp"])
    for i, (w, b) in enumerate(params["mlp"]):
        s = s @ w + b
        if i < n_mlp - 1 and mlp_act == "relu":
            s = jnp.maximum(s, 0.0)
    probs = jax.nn.softmax(s, axis=-1)
    mincut_num = jnp.sum(probs * (adj @ probs))
    deg = jnp.sum(adj, axis=-1)
    mincut_den = jnp.sum(deg[:, None] * probs * probs)
    mc = -(mincut_num / mincut_den)
    ss = probs.T @ probs
    c = probs.shape[-1]
    o = jnp.linalg.norm(ss / jnp.linalg.norm(ss) - jnp.eye(c) / jnp.sqrt(float(c)))
    return probs, mc, o


# ------------------------------ main ------------------------------ #

if __name__ == "__main__":
    key = jax.random.PRNGKey(0)
    N, DIM_IN = 16, 8
    MP_UNITS = [32, 32]
    MLP_UNITS = [16]
    NUM_CLUSTERS = 4

    k_par, k_x, k_w = jax.random.split(key, 3)
    params = init_sc_layer_params(k_par, DIM_IN, MP_UNITS, MLP_UNITS, NUM_CLUSTERS)

    x = jax.random.normal(k_x, (N, DIM_IN), jnp.float32)
    # undirected ring graph (both directions), positive weights
    src = jnp.arange(N, dtype=jnp.int32)
    dst = (src + 1) % N
    edge_index = jnp.concatenate(
        [jnp.stack([src, dst]), jnp.stack([dst, src])], axis=1)      # (2, 32)
    edge_weight = jax.random.uniform(k_w, (edge_index.shape[1],),
                                     jnp.float32, 0.1, 1.0)          # (32,)

    probs, mc_loss, o_loss = sc_layer_forward(params, x, edge_index, edge_weight)
    jax.block_until_ready((probs, mc_loss, o_loss))

    probs_r, mc_r, o_r = sc_layer_reference(params, x, edge_index, edge_weight)
    # Tolerance accounts for the documented perf trade: the O(N^2) adjacency (and the MXU
    # aggregation partners) are bf16-quantized in the kernel (f32 accumulate); end-to-end
    # deviation from the pure-f32 reference is a few 1e-3 at these magnitudes.
    TOL = 2e-2
    np.testing.assert_allclose(np.asarray(probs), np.asarray(probs_r), rtol=TOL, atol=TOL)
    np.testing.assert_allclose(float(mc_loss), float(mc_r), rtol=TOL, atol=TOL)
    np.testing.assert_allclose(float(o_loss), float(o_r), rtol=TOL, atol=TOL)
    # softmax rows must sum to 1 (Newton-refined EUP reciprocal)
    np.testing.assert_allclose(np.asarray(jnp.sum(probs, axis=-1)),
                               np.ones(N, np.float32), rtol=1e-5, atol=1e-5)

    print("KERNEL_OK")
</pallas_src>

<mosaic_0001>
module attributes {stable_mosaic.version = 11 : i64} {
  func.func @kernel(%arg0: memref<16x16xbf16, #tpu.memory_space<vmem>>, %arg1: memref<16x8xf32, #tpu.memory_space<vmem>>, %arg2: memref<160x128xf32, #tpu.memory_space<vmem>>, %arg3: memref<16x128xf32, #tpu.memory_space<vmem>>, %arg4: memref<1x1xf32, #tpu.memory_space<vmem>>, %arg5: memref<1x1xf32, #tpu.memory_space<vmem>>) attributes {dimension_semantics = [], scalar_prefetch = 0 : i64, scratch_operands = 0 : i64, tpu.core_type = #tpu.core_type<tc>} {
    %c0 = arith.constant 0 : index
    %c0_0 = arith.constant 0 : index
    %0 = vector.load %arg0[%c0, %c0_0] : memref<16x16xbf16, #tpu.memory_space<vmem>>, vector<16x16xbf16>
    %c0_1 = arith.constant 0 : index
    %c0_2 = arith.constant 0 : index
    %1 = vector.load %arg1[%c0_1, %c0_2] : memref<16x8xf32, #tpu.memory_space<vmem>>, vector<16x8xf32>
    %2 = arith.truncf %1 : vector<16x8xf32> to vector<16x8xbf16>
    %cst = arith.constant dense<0.000000e+00> : vector<16x8xf32>
    %3 = tpu.matmul %0, %2, %cst {dimension_numbers = #tpu.dot_dimension_numbers<[1], [0], [0], [1], [0, 0, 1, 1], [], []>} : vector<16x16xbf16>, vector<16x8xbf16>, vector<16x8xf32> -> vector<16x8xf32>
    %4 = tpu.concatenate %3, %1 in 1 : vector<16x8xf32>, vector<16x8xf32> -> vector<16x16xf32>
    %c0_3 = arith.constant 0 : index
    %c0_4 = arith.constant 0 : index
    %5 = vector.load %arg2[%c0_3, %c0_4] : memref<160x128xf32, #tpu.memory_space<vmem>>, vector<16x32xf32>
    %c16 = arith.constant 16 : index
    %c0_5 = arith.constant 0 : index
    %6 = vector.load %arg2[%c16, %c0_5] : memref<160x128xf32, #tpu.memory_space<vmem>>, vector<1x32xf32>
    %cst_6 = arith.constant dense<0.000000e+00> : vector<16x32xf32>
    %7 = tpu.matmul %4, %5, %cst_6 {dimension_numbers = #tpu.dot_dimension_numbers<[1], [0], [0], [1], [0, 0, 1, 1], [], []>} : vector<16x16xf32>, vector<16x32xf32>, vector<16x32xf32> -> vector<16x32xf32>
    %8 = vector.broadcast %6 : vector<1x32xf32> to vector<16x32xf32>
    %9 = arith.addf %7, %8 : vector<16x32xf32>
    %cst_7 = arith.constant 0.000000e+00 : f32
    %10 = vector.broadcast %cst_7 : f32 to vector<16x32xf32>
    %11 = arith.maximumf %9, %10 : vector<16x32xf32>
    %12 = arith.truncf %11 : vector<16x32xf32> to vector<16x32xbf16>
    %cst_8 = arith.constant dense<0.000000e+00> : vector<16x32xf32>
    %13 = tpu.matmul %0, %12, %cst_8 {dimension_numbers = #tpu.dot_dimension_numbers<[1], [0], [0], [1], [0, 0, 1, 1], [], []>} : vector<16x16xbf16>, vector<16x32xbf16>, vector<16x32xf32> -> vector<16x32xf32>
    %14 = tpu.concatenate %13, %11 in 1 : vector<16x32xf32>, vector<16x32xf32> -> vector<16x64xf32>
    %c24 = arith.constant 24 : index
    %c0_9 = arith.constant 0 : index
    %15 = vector.load %arg2[%c24, %c0_9] : memref<160x128xf32, #tpu.memory_space<vmem>>, vector<64x32xf32>
    %c88 = arith.constant 88 : index
    %c0_10 = arith.constant 0 : index
    %16 = vector.load %arg2[%c88, %c0_10] : memref<160x128xf32, #tpu.memory_space<vmem>>, vector<1x32xf32>
    %cst_11 = arith.constant dense<0.000000e+00> : vector<16x32xf32>
    %17 = tpu.matmul %14, %15, %cst_11 {dimension_numbers = #tpu.dot_dimension_numbers<[1], [0], [0], [1], [0, 0, 1, 1], [], []>} : vector<16x64xf32>, vector<64x32xf32>, vector<16x32xf32> -> vector<16x32xf32>
    %18 = vector.broadcast %16 : vector<1x32xf32> to vector<16x32xf32>
    %19 = arith.addf %17, %18 : vector<16x32xf32>
    %cst_12 = arith.constant 0.000000e+00 : f32
    %20 = vector.broadcast %cst_12 : f32 to vector<16x32xf32>
    %21 = arith.maximumf %19, %20 : vector<16x32xf32>
    %c96 = arith.constant 96 : index
    %c0_13 = arith.constant 0 : index
    %22 = vector.load %arg2[%c96, %c0_13] : memref<160x128xf32, #tpu.memory_space<vmem>>, vector<32x16xf32>
    %c128 = arith.constant 128 : index
    %c0_14 = arith.constant 0 : index
    %23 = vector.load %arg2[%c128, %c0_14] : memref<160x128xf32, #tpu.memory_space<vmem>>, vector<1x16xf32>
    %cst_15 = arith.constant dense<0.000000e+00> : vector<16x16xf32>
    %24 = tpu.matmul %21, %22, %cst_15 {dimension_numbers = #tpu.dot_dimension_numbers<[1], [0], [0], [1], [0, 0, 1, 1], [], []>} : vector<16x32xf32>, vector<32x16xf32>, vector<16x16xf32> -> vector<16x16xf32>
    %25 = vector.broadcast %23 : vector<1x16xf32> to vector<16x16xf32>
    %26 = arith.addf %24, %25 : vector<16x16xf32>
    %cst_16 = arith.constant 0.000000e+00 : f32
    %27 = vector.broadcast %cst_16 : f32 to vector<16x16xf32>
    %28 = arith.maximumf %26, %27 : vector<16x16xf32>
    %c136 = arith.constant 136 : index
    %c0_17 = arith.constant 0 : index
    %29 = vector.load %arg2[%c136, %c0_17] : memref<160x128xf32, #tpu.memory_space<vmem>>, vector<16x128xf32>
    %c152 = arith.constant 152 : index
    %c0_18 = arith.constant 0 : index
    %30 = vector.load %arg2[%c152, %c0_18] : memref<160x128xf32, #tpu.memory_space<vmem>>, vector<1x128xf32>
    %cst_19 = arith.constant dense<0.000000e+00> : vector<16x128xf32>
    %31 = tpu.matmul %28, %29, %cst_19 {dimension_numbers = #tpu.dot_dimension_numbers<[1], [0], [0], [1], [0, 0, 1, 1], [], []>} : vector<16x16xf32>, vector<16x128xf32>, vector<16x128xf32> -> vector<16x128xf32>
    %32 = vector.broadcast %30 : vector<1x128xf32> to vector<16x128xf32>
    %33 = arith.addf %31, %32 : vector<16x128xf32>
    %cst_20 = arith.constant dense<0xFF800000> : vector<16xf32>
    %34 = vector.multi_reduction <maximumf>, %33, %cst_20 [1] : vector<16x128xf32> to vector<16xf32>
    %35 = vector.shape_cast %34 : vector<16xf32> to vector<16x1xf32>
    %36 = vector.broadcast %35 : vector<16x1xf32> to vector<16x128xf32>
    %37 = arith.subf %33, %36 : vector<16x128xf32>
    %38 = math.exp %37 : vector<16x128xf32>
    %cst_21 = arith.constant dense<0.000000e+00> : vector<16xf32>
    %39 = vector.multi_reduction <add>, %38, %cst_21 [1] : vector<16x128xf32> to vector<16xf32>
    %40 = vector.shape_cast %39 : vector<16xf32> to vector<16x1xf32>
    %41 = tpu.reciprocal %40 {approx = true} : vector<16x1xf32> -> vector<16x1xf32>
    %42 = arith.mulf %40, %41 : vector<16x1xf32>
    %cst_22 = arith.constant 2.000000e+00 : f32
    %43 = vector.broadcast %cst_22 : f32 to vector<16x1xf32>
    %44 = arith.subf %43, %42 : vector<16x1xf32>
    %45 = arith.mulf %41, %44 : vector<16x1xf32>
    %46 = vector.broadcast %45 : vector<16x1xf32> to vector<16x128xf32>
    %47 = arith.mulf %38, %46 : vector<16x128xf32>
    %c0_23 = arith.constant 0 : index
    %c0_24 = arith.constant 0 : index
    %48 = vector.load %arg3[%c0_23, %c0_24] : memref<16x128xf32, #tpu.memory_space<vmem>>, vector<16x128xf32>
    tpu.vector_store %arg3[%c0_23, %c0_24], %47 {strides = array<i32>} : memref<16x128xf32, #tpu.memory_space<vmem>>, vector<16x128xf32>,
    %49 = arith.truncf %47 : vector<16x128xf32> to vector<16x128xbf16>
    %cst_25 = arith.constant dense<0.000000e+00> : vector<16x128xf32>
    %50 = tpu.matmul %0, %49, %cst_25 {dimension_numbers = #tpu.dot_dimension_numbers<[1], [0], [0], [1], [0, 0, 1, 1], [], []>} : vector<16x16xbf16>, vector<16x128xbf16>, vector<16x128xf32> -> vector<16x128xf32>
    %51 = arith.mulf %47, %50 : vector<16x128xf32>
    %52 = vector.shape_cast %51 : vector<16x128xf32> to vector<1x16x128xf32>
    %cst_26 = arith.constant dense<0.000000e+00> : vector<1xf32>
    %53 = vector.multi_reduction <add>, %52, %cst_26 [1, 2] : vector<1x16x128xf32> to vector<1xf32>
    %54 = vector.shape_cast %53 : vector<1xf32> to vector<1x1x1xf32>
    %55 = vector.extract %54[0, 0, 0] : f32 from vector<1x1x1xf32>
    %56 = arith.mulf %47, %47 : vector<16x128xf32>
    %cst_27 = arith.constant dense<0.000000e+00> : vector<16xf32>
    %57 = vector.multi_reduction <add>, %56, %cst_27 [1] : vector<16x128xf32> to vector<16xf32>
    %58 = vector.shape_cast %57 : vector<16xf32> to vector<16x1xf32>
    %59 = arith.truncf %58 : vector<16x1xf32> to vector<16x1xbf16>
    %cst_28 = arith.constant dense<0.000000e+00> : vector<16x1xf32>
    %60 = tpu.matmul %0, %59, %cst_28 {dimension_numbers = #tpu.dot_dimension_numbers<[1], [0], [0], [1], [0, 0, 1, 1], [], []>} : vector<16x16xbf16>, vector<16x1xbf16>, vector<16x1xf32> -> vector<16x1xf32>
    %61 = vector.shape_cast %60 : vector<16x1xf32> to vector<1x16x1xf32>
    %cst_29 = arith.constant dense<0.000000e+00> : vector<1xf32>
    %62 = vector.multi_reduction <add>, %61, %cst_29 [1, 2] : vector<1x16x1xf32> to vector<1xf32>
    %63 = vector.shape_cast %62 : vector<1xf32> to vector<1x1x1xf32>
    %64 = vector.extract %63[0, 0, 0] : f32 from vector<1x1x1xf32>
    %65 = arith.divf %55, %64 : f32
    %cst_30 = arith.constant 0.000000e+00 : f32
    %66 = arith.subf %cst_30, %65 : f32
    %cst_31 = arith.constant dense<0.000000e+00> : vector<128x128xf32>
    %67 = tpu.matmul %47, %47, %cst_31 {dimension_numbers = #tpu.dot_dimension_numbers<[0], [0], [1], [1], [0, 1, 1, 1], [], []>} : vector<16x128xf32>, vector<16x128xf32>, vector<128x128xf32> -> vector<128x128xf32>
    %68 = arith.mulf %67, %67 : vector<128x128xf32>
    %69 = vector.shape_cast %68 : vector<128x128xf32> to vector<1x128x128xf32>
    %cst_32 = arith.constant dense<0.000000e+00> : vector<1xf32>
    %70 = vector.multi_reduction <add>, %69, %cst_32 [1, 2] : vector<1x128x128xf32> to vector<1xf32>
    %71 = vector.shape_cast %70 : vector<1xf32> to vector<1x1x1xf32>
    %72 = vector.extract %71[0, 0, 0] : f32 from vector<1x1x1xf32>
    %73 = math.sqrt %72 : f32
    %74 = vector.shape_cast %58 : vector<16x1xf32> to vector<1x16x1xf32>
    %cst_33 = arith.constant dense<0.000000e+00> : vector<1xf32>
    %75 = vector.multi_reduction <add>, %74, %cst_33 [1, 2] : vector<1x16x1xf32> to vector<1xf32>
    %76 = vector.shape_cast %75 : vector<1xf32> to vector<1x1x1xf32>
    %77 = vector.extract %76[0, 0, 0] : f32 from vector<1x1x1xf32>
    %78 = arith.divf %77, %73 : f32
    %cst_34 = arith.constant 2.000000e+00 : f32
    %79 = arith.mulf %cst_34, %78 : f32
    %cst_35 = arith.constant 5.000000e-01 : f32
    %80 = arith.mulf %79, %cst_35 : f32
    %cst_36 = arith.constant 2.000000e+00 : f32
    %81 = arith.subf %cst_36, %80 : f32
    %cst_37 = arith.constant 0.000000e+00 : f32
    %82 = arith.maximumf %81, %cst_37 : f32
    %83 = math.sqrt %82 : f32
    %84 = vector.broadcast %66 : f32 to vector<1x1xf32>
    %c0_38 = arith.constant 0 : index
    %c0_39 = arith.constant 0 : index
    %85 = vector.load %arg4[%c0_38, %c0_39] : memref<1x1xf32, #tpu.memory_space<vmem>>, vector<1x1xf32>
    tpu.vector_store %arg4[%c0_38, %c0_39], %84 {strides = array<i32>} : memref<1x1xf32, #tpu.memory_space<vmem>>, vector<1x1xf32>,
    %86 = vector.broadcast %83 : f32 to vector<1x1xf32>
    %c0_40 = arith.constant 0 : index
    %c0_41 = arith.constant 0 : index
    %87 = vector.load %arg5[%c0_40, %c0_41] : memref<1x1xf32, #tpu.memory_space<vmem>>, vector<1x1xf32>
    tpu.vector_store %arg5[%c0_40, %c0_41], %86 {strides = array<i32>} : memref<1x1xf32, #tpu.memory_space<vmem>>, vector<1x1xf32>,
    return
  }
}

</mosaic_0001>

<bundles_post_ra>
// kernel: tpu_custom_call.1
= control target key start
LH: loop header
LB: loop body
LE: loop exit
PB: predicated region body
PF: predicated region fallthrough
CT: control target
= control target key end

     0   :  { %11 = vsyncpa [#allocation3], 0  ;;  %s946_s0 = inlined_call_operand.vmem [shape: bf16[16,16], index: 0, kind: input, shape index: {}]   ;;  %s947_s1 = inlined_call_operand.vmem [shape: f32[16,8], index: 1, kind: input, shape index: {}]   ;;  %s948_s2 = inlined_call_operand.hbm [shape: f32[160,128], index: 2, kind: input, shape index: {}]   ;;  %s949_s3 = inlined_call_operand.hbm [shape: f32[16,128], index: 3, kind: output, shape index: {0}]   ;;  %s950_s4 = inlined_call_operand.hbm [shape: f32[1,1], index: 4, kind: output, shape index: {1}]   ;;  %s951_s5 = inlined_call_operand.hbm [shape: f32[1,1], index: 5, kind: output, shape index: {2}]  }
   0x1   :  { %12 = vsyncpa [#allocation4], 0 }
   0x2   :  { %13 = vsyncpa [#allocation7], 0  ;;  %s22_s20 = sshll.u32 %s948_s2, 4  ;;  %s840_s21 = smov [#allocation2]   ;;  %s23_s20 = int_to_ptr.hbm [resolvable:$true] %s22_s20 }
   0x3   :  { %s24_s22 = sshll.u32 %s840_s21, 4  ;;  %s841_s23 = smov 128   ;;  %s25_s22 = int_to_ptr.vmem [resolvable:$true] %s24_s22 }
   0x4   :  { %s842_s24 = smov 8  }
   0x5   :  { %30 = dma.hbm_to_vmem [thread:$0]  %s23_s20, 2560, %s25_s22, [#allocation3], %s841_s23, %s841_s23, %s842_s24  }
   0x6   :  { %834 = dma.done.wait [#allocation3], 2560  }
   0x7   :  { %835 = vsyncadd [#allocation3], 4294964736  ;;  %v38_v0 = vld [vmem:[%s947_s1] sm:$0xff]  ;;  %v39_v1 = vld [vmem:[%s947_s1 + $0x8] sm:$0xff]  ;;  %vm46_vm0 = vcmask 130048   ;;  %vm72_vm1 = vcmask 64512  }
   0x8   :  { %v40_v2 = vpack.c.bf16 %v39_v1, %v38_v0  ;;  %66 = vrot.lane.b32.xlu0 %v38_v0, %s842_s24  ;;  %v76_v3 = vld [vmem:[#allocation2 + $0x8] sm:$0xff]  ;;  %v894_v4 = vld [vmem:[%s946_s0] sm:$0xff]  ;;  %v718_v12 = vld [vmem:[#allocation2 + $0x10] ss:$0 sm:$0xff]  ;;  %s843_s0 = smov 32   ;;  %vm133_vm2 = vcmask 261120  }
   0x9   :  { %99 = vmatpush.msra.mxu0 %v76_v3  ;;  %687 = vmatpush.msra.mxu1 %v76_v3  ;;  %v75_v5 = vld [vmem:[#allocation2] sm:$0xff]  ;;  %v143_v20 = vld [vmem:[#allocation2 + $0x50] sm:$0xff]  ;;  %v142_v21 = vld [vmem:[#allocation2 + $0x48] sm:$0xff]  ;;  %vm146_vm3 = vcmask 523264   ;;  %vm322_vm4 = vcmask 7168   ;;  %vm600_vm9 = vcmask 0  }
   0xa   :  { %57 = vmatpush.bf16.msra.mxu3 %v40_v2  ;;  %v141_v22 = vld [vmem:[#allocation2 + $0x40] sm:$0xff]  ;;  %v140_v23 = vld [vmem:[#allocation2 + $0x38] sm:$0xff]  ;;  %v139_v24 = vld [vmem:[#allocation2 + $0x30] sm:$0xff]  ;;  %s844_s11 = smov [#allocation6]   ;;  %s624_s15 = sshll.u32 %s950_s4, 4  ;;  %s625_s15 = int_to_ptr.hbm [resolvable:$true] %s624_s15 }
   0xb   :  { %100 = vmatpush.msra.mxu0 %v75_v5  ;;  %688 = vmatpush.msra.mxu1 %v75_v5  ;;  %v138_v25 = vld [vmem:[#allocation2 + $0x28] sm:$0xff]  ;;  %v137_v26 = vld [vmem:[#allocation2 + $0x20] sm:$0xff]  ;;  %v136_v27 = vld [vmem:[#allocation2 + $0x18] sm:$0xff]  ;;  %s622_s12 = sshll.u32 %s844_s11, 4  ;;  %s610_s18 = sshll.u32 %s949_s3, 4  ;;  %s623_s12 = int_to_ptr.vmem [resolvable:$true] %s622_s12  ;;  %s611_s18 = int_to_ptr.hbm [resolvable:$true] %s610_s18 }
   0xc   :  { %v181_v28 = vld [vmem:[#allocation2 + $0x78] sm:$0xff]  ;;  %v180_v35 = vld [vmem:[#allocation2 + $0x70] sm:$0xff]  ;;  %v179_v36 = vld [vmem:[#allocation2 + $0x68] sm:$0xff]  ;;  %s845_s19 = smov [#allocation5]   ;;  %s846_s28 = smov 0.0  }
   0xd   :  { %658 = vmatmul.msk.bf16.vlgmr.msra.gmra.mxu3 %vm46_vm0, %v894_v4  ;;  %202 = vmatpush.msrb.mxu0 %v181_v28  ;;  %v178_v37 = vld [vmem:[#allocation2 + $0x60] sm:$0xff]  ;;  %v719_v38 = vld [vmem:[#allocation2 + $0x58] ss:$0 sm:$0xff]  ;;  %v216_v45 = vld [vmem:[#allocation2 + $0x90] sm:$0xff]  ;;  %s608_s20 = sshll.u32 %s845_s19, 4  ;;  %s847_s3 = smov [#allocation8]   ;;  %s609_s20 = int_to_ptr.vmem [resolvable:$true] %s608_s20 }
   0xe   :  { %239 = vmatpush.msrb.mxu1 %v216_v45  ;;  %v215_v46 = vld [vmem:[#allocation2 + $0x88] sm:$0xff]  ;;  %v720_v47 = vld [vmem:[#allocation2 + $0x80] ss:$0 sm:$0xff]  ;;  %v721_v54 = vld [vmem:[#allocation2 + $0x98] ss:$0 sm:$0xff] }
   0xf   :  { %203 = vmatpush.msrb.mxu0 %v180_v35 }
  0x10   :  { %68 = vrot.lane.b32.xlu0 %v39_v1, %s842_s24  ;;  %240 = vmatpush.msrb.mxu1 %v215_v46 }
  0x11   :  { %204 = vmatpush.msrb.mxu0 %v179_v36 }
  0x13   :  { %205 = vmatpush.msrb.mxu0 %v178_v37 }
  0x7a   :  { %v67_v6 = vpop.permute.xlu0 %66 }
  0x82   :  { %v69_v9 = vpop.permute.xlu0 %68 }
  0x90   :  { %v59_v7 = vpop.f32.mrf.mxu3 }
  0x91   :  { %v73_v8 = vsel %vm72_vm1, %v59_v7, %v67_v6 }
  0x92   :  { %659 = vmatmul.msk.f32.vlgmr.msra.gmra.mxu0 %vm46_vm0, %v73_v8 }
  0x98   :  { %v61_v10 = vpop.f32.mrf.mxu3 }
  0x99   :  { %v74_v11 = vsel %vm72_vm1, %v61_v10, %v69_v9 }
  0x9a   :  { %660 = vmatmul.msk.f32.vlgmr.msra.gmra.mxu1 %vm46_vm0, %v74_v11 }
 0x10f   :  { %v102_v13 = vpop.f32.mrf.mxu0 }
 0x110   :  { %v103_v14 = vadd.f32 %v718_v12, %v102_v13 }
 0x112   :  { %v108_v15 = vmax.f32 %v103_v14, 0.0 }
 0x114   :  { %127 = vrot.lane.b32.xlu1 %v108_v15, %s843_s0 }
 0x117   :  { %v105_v16 = vpop.f32.mrf.mxu1 }
 0x118   :  { %v106_v17 = vadd.f32 %v718_v12, %v105_v16 }
 0x11a   :  { %v109_v18 = vmax.f32 %v106_v17, 0.0 }
 0x11c   :  { %129 = vrot.lane.b32.xlu1 %v109_v18, %s843_s0  ;;  %v110_v19 = vpack.c.bf16 %v109_v18, %v108_v15  ;;  %s635_s0 = sshll.u32 %s951_s5, 4  ;;  %s636_s0 = int_to_ptr.hbm [resolvable:$true] %s635_s0 }
 0x11e   :  { %118 = vmatpush.bf16.msrb.mxu3 %v110_v19 }
 0x121   :  { %661 = vmatmul.msk.bf16.vlgmr.msrb.gmra.mxu3 %vm46_vm0, %v894_v4 }
 0x122   :  { %161 = vmatpush.msra.mxu3 %v143_v20 }
 0x124   :  { %162 = vmatpush.msra.mxu3 %v142_v21 }
 0x126   :  { %163 = vmatpush.msra.mxu3 %v141_v22 }
 0x128   :  { %164 = vmatpush.msra.mxu3 %v140_v23 }
 0x12a   :  { %165 = vmatpush.msra.mxu3 %v139_v24 }
 0x12c   :  { %166 = vmatpush.msra.mxu3 %v138_v25 }
 0x12e   :  { %167 = vmatpush.msra.mxu3 %v137_v26 }
 0x130   :  { %168 = vmatpush.msra.mxu3 %v136_v27 }
 0x186   :  { %v128_v29 = vpop.permute.xlu1 %127 }
 0x18e   :  { %v130_v32 = vpop.permute.xlu1 %129 }
 0x1a4   :  { %v120_v30 = vpop.f32.mrf.mxu3 }
 0x1a5   :  { %v134_v31 = vsel %vm133_vm2, %v120_v30, %v128_v29 }
 0x1a6   :  { %662 = vmatmul.msk.f32.vlgmr.msra.gmra.mxu3 %vm146_vm3, %v134_v31 }
 0x1ac   :  { %v122_v33 = vpop.f32.mrf.mxu3 }
 0x1ad   :  { %v135_v34 = vsel %vm133_vm2, %v122_v33, %v130_v32 }
 0x1ae   :  { %663 = vmatmul.msk.f32.gmra.mxu3 %vm146_vm3, %v135_v34 }
 0x229   :  { %v170_v39 = vpop.f32.mrf.mxu3 }
 0x22a   :  { %v171_v40 = vadd.f32 %v719_v38, %v170_v39 }
 0x22c   :  { %v176_v41 = vmax.f32 %v171_v40, 0.0 }
 0x22e   :  { %664 = vmatmul.msk.f32.vlgmr.msrb.gmra.mxu0 %vm133_vm2, %v176_v41 }
 0x231   :  { %v173_v42 = vpop.f32.mrf.mxu3 }
 0x232   :  { %v174_v43 = vadd.f32 %v719_v38, %v173_v42 }
 0x234   :  { %v177_v44 = vmax.f32 %v174_v43, 0.0 }
 0x236   :  { %665 = vmatmul.msk.f32.gmra.mxu0 %vm133_vm2, %v177_v44 }
 0x2ab   :  { %v207_v48 = vpop.f32.mrf.mxu0 }
 0x2ac   :  { %v208_v49 = vadd.f32 %v720_v47, %v207_v48 }
 0x2ae   :  { %v213_v50 = vmax.f32 %v208_v49, 0.0 }
 0x2b0   :  { %666 = vmatmul.msk.f32.vlgmr.msrb.gmra.mxu1 %vm46_vm0, %v213_v50 }
 0x2b3   :  { %v210_v51 = vpop.f32.mrf.mxu0 }
 0x2b4   :  { %v211_v52 = vadd.f32 %v720_v47, %v210_v51 }
 0x2b6   :  { %v214_v53 = vmax.f32 %v211_v52, 0.0 }
 0x2b8   :  { %667 = vmatmul.msk.f32.gmra.mxu1 %vm46_vm0, %v214_v53 }
 0x32d   :  { %v242_v55 = vpop.f32.mrf.mxu1 }
 0x32e   :  { %v243_v56 = vadd.f32 %v721_v54, %v242_v55 }
 0x330   :  { %248 = vmax.xlane.f32.xlu2 %v243_v56 }
 0x335   :  { %v245_v57 = vpop.f32.mrf.mxu1 }
 0x336   :  { %v246_v58 = vadd.f32 %v721_v54, %v245_v57 }
 0x338   :  { %250 = vmax.xlane.f32.xlu2 %v246_v58 }
 0x3a3   :  { %v249_v59 = vpop.xlane.xlu2 %248 }
 0x3a4   :  { %v252_v60 = vsub.f32 %v243_v56, %v249_v59 }
 0x3a6   :  { %v254_v61 = vmul.f32 1.442695, %v252_v60 }
 0x3a8   :  { %722 = vpow2.f32 %v254_v61 }
 0x3ab   :  { %v251_v62 = vpop.xlane.xlu2 %250 }
 0x3ac   :  { %v253_v63 = vsub.f32 %v246_v58, %v251_v62 }
 0x3ae   :  { %v723_v0 = vpop.eup %722  ;;  %v256_v1 = vmul.f32 1.442695, %v253_v63 }
 0x3af   :  { %258 = vadd.xlane.f32.xlu0 %v723_v0 }
 0x3b0   :  { %724 = vpow2.f32 %v256_v1 }
 0x3b6   :  { %v725_v2 = vpop.eup %724 }
 0x3b7   :  { %260 = vadd.xlane.f32.xlu1 %v725_v2 }
 0x422   :  { %v259_v3 = vpop.xlane.xlu0 %258 }
 0x423   :  { %726 = vrcp.f32 %v259_v3 }
 0x429   :  { %v727_v5 = vpop.eup %726 }
 0x42a   :  { %v264_v6 = vmul.f32 %v727_v5, %v259_v3  ;;  %v261_v7 = vpop.xlane.xlu1 %260 }
 0x42b   :  { %728 = vrcp.f32 %v261_v7 }
 0x42c   :  { %v266_v8 = vsub.f32 2.0, %v264_v6 }
 0x42e   :  { %v268_v9 = vmul.f32 %v727_v5, %v266_v8 }
 0x430   :  { %v270_v10 = vmul.f32 %v723_v0, %v268_v9 }
 0x431   :  { %v729_v11 = vpop.eup %728 }
 0x432   :  { %272 = vst [vmem:[#allocation5] sm:$0xff] %v270_v10  ;;  %v265_v12 = vmul.f32 %v729_v11, %v261_v7  ;;  %v301_v13 = vmul.f32 %v270_v10, %v270_v10 }
 0x434   :  { %v267_v14 = vsub.f32 2.0, %v265_v12  ;;  %303 = vadd.xlane.f32.xlu2 %v301_v13 }
 0x436   :  { %v269_v15 = vmul.f32 %v729_v11, %v267_v14 }
 0x438   :  { %v271_v16 = vmul.f32 %v725_v2, %v269_v15 }
 0x43a   :  { %273 = vst [vmem:[#allocation5 + $0x8] sm:$0xff] %v271_v16  ;;  %447 = vmatpush.msra.mxu0 %v271_v16  ;;  %689 = vmatpush.msra.mxu1 %v271_v16  ;;  %v302_v17 = vmul.f32 %v271_v16, %v271_v16  ;;  %v274_v18 = vpack.c.bf16 %v271_v16, %v270_v10 }
 0x43b   :  { %616 = dma.vmem_to_hbm [thread:$0]  %s609_s20, 256, %s611_s18, [#allocation4], %s841_s23, %s841_s23, %s842_s24  }
 0x43c   :  { %448 = vmatpush.msra.mxu0 %v270_v10  ;;  %691 = vmatpush.msra.mxu1 %v270_v10  ;;  %s633_s23 = sshll.u32 %s847_s3, 4  ;;  %s634_s23 = int_to_ptr.vmem [resolvable:$true] %s633_s23 }
 0x43d   :  { %305 = vadd.xlane.f32.xlu2 %v302_v17  ;;  %282 = vmatpush.bf16.msra.mxu2 %v274_v18 }
 0x440   :  { %668 = vmatmul.msk.bf16.vlgmr.msra.gmra.mxu2 %vm46_vm0, %v894_v4 }
 0x441   :  { %690 = vmatpush.msrb.mxu2 %v271_v16 }
 0x443   :  { %692 = vmatpush.msrb.mxu2 %v270_v10 }
 0x466   :  { %353 = vxpose.xlu2.b32.start [1/2] (short) %v270_v10, 128 }
 0x46e   :  { %354 = vxpose.xlu2.b32.end [2/2] (short) %v271_v16, 128 }
 0x4a7   :  { %v304_v19 = vpop.xlane.xlu2 %303 }
 0x4a8   :  { %v552_v46 = vsel %vm322_vm4, %v304_v19, 0.0 }
 0x4b0   :  { %v306_v20 = vpop.xlane.xlu2 %305 }
 0x4b1   :  { %v307_v21 = vpack.c.bf16 %v306_v20, %v304_v19  ;;  %v553_v44 = vsel %vm322_vm4, %v306_v20, 0.0 }
 0x4b2   :  { %v554_v48 = vadd.f32 %v553_v44, %v552_v46 }
 0x4b3   :  { %315 = vmatpush.bf16.msrb.mxu3 %v307_v21 }
 0x4b6   :  { %669 = vmatmul.msk.bf16.vlgmr.msrb.gmra.mxu3 %vm46_vm0, %v894_v4 }
 0x4c3   :  { %v284_v22 = vpop.f32.mrf.mxu2 }
 0x4c4   :  { %v289_v24 = vmul.f32 %v284_v22, %v270_v10 }
 0x4cb   :  { %v286_v23 = vpop.f32.mrf.mxu2 }
 0x4cc   :  { %v290_v25 = vmul.f32 %v286_v23, %v271_v16 }
 0x4ce   :  { %v291_v26 = vadd.f32 %v290_v25, %v289_v24 }
 0x4d0   :  { %292 = vadd.xlane.f32.xlu0 %v291_v26 }
 0x4ff   :  { %v369_v27 = vpop.trf.xlu2 }
 0x500   :  { %670 = vmatmul.msk.f32.vlgmr.msra.gmra.mxu0 %vm46_vm0, %v369_v27 }
 0x507   :  { %v370_v28 = vpop.trf.xlu2 }
 0x508   :  { %671 = vmatmul.msk.f32.gmra.mxu0 %vm46_vm0, %v370_v28 }
 0x50f   :  { %v371_v29 = vpop.trf.xlu2 }
 0x510   :  { %672 = vmatmul.msk.f32.gmra.mxu0 %vm46_vm0, %v371_v29 }
 0x517   :  { %v372_v30 = vpop.trf.xlu2 }
 0x518   :  { %673 = vmatmul.msk.f32.gmra.mxu0 %vm46_vm0, %v372_v30 }
 0x51f   :  { %v373_v31 = vpop.trf.xlu2 }
 0x520   :  { %674 = vmatmul.msk.f32.gmra.mxu0 %vm46_vm0, %v373_v31 }
 0x527   :  { %v374_v4 = vpop.trf.xlu2 }
 0x528   :  { %675 = vmatmul.msk.f32.vlgmr.msra.gmra.mxu1 %vm46_vm0, %v374_v4 }
 0x52f   :  { %v375_v32 = vpop.trf.xlu2 }
 0x530   :  { %676 = vmatmul.msk.f32.gmra.mxu1 %vm46_vm0, %v375_v32 }
 0x537   :  { %v376_v33 = vpop.trf.xlu2 }
 0x538   :  { %677 = vmatmul.msk.f32.gmra.mxu1 %vm46_vm0, %v376_v33 }
 0x539   :  { %v317_v34 = vpop.f32.mrf.mxu3 }
 0x53a   :  { %v323_v36 = vsel %vm322_vm4, %v317_v34, 0.0 }
 0x53f   :  { %v377_v35 = vpop.trf.xlu2 }
 0x540   :  { %678 = vmatmul.msk.f32.gmra.mxu1 %vm46_vm0, %v377_v35 }
 0x541   :  { %v319_v37 = vpop.f32.mrf.mxu3 }
 0x542   :  { %v324_v38 = vsel %vm322_vm4, %v319_v37, 0.0 }
 0x543   :  { %v293_v39 = vpop.xlane.xlu0 %292  ;;  %v325_v40 = vadd.f32 %v324_v38, %v323_v36 }
 0x544   :  { %v294_v41 = vrot.slane %v293_v39, 4 }
 0x545   :  { %326 = vadd.xlane.f32.xlu1 %v325_v40 }
 0x546   :  { %v295_v42 = vadd.f32 %v294_v41, %v293_v39 }
 0x547   :  { %v378_v43 = vpop.trf.xlu2 }
 0x548   :  { %v296_v45 = vrot.slane %v295_v42, 2  ;;  %679 = vmatmul.msk.f32.gmra.mxu1 %vm46_vm0, %v378_v43 }
 0x54a   :  { %v297_v47 = vadd.f32 %v296_v45, %v295_v42 }
 0x54c   :  { %v298_v49 = vrot.slane %v297_v47, 1 }
 0x54d   :  { %555 = vadd.xlane.f32.xlu1 %v554_v48 }
 0x54e   :  { %v299_v50 = vadd.f32 %v298_v49, %v297_v47 }
 0x54f   :  { %v379_v51 = vpop.trf.xlu2 }
 0x550   :  { %693 = vpush %v299_v50  ;;  %680 = vmatmul.msk.f32.vlgmr.msrb.gmra.mxu2 %vm46_vm0, %v379_v51 }
 0x557   :  { %v380_v52 = vpop.trf.xlu2 }
 0x558   :  { %681 = vmatmul.msk.f32.gmra.mxu2 %vm46_vm0, %v380_v52 }
 0x55f   :  { %v381_v53 = vpop.trf.xlu2 }
 0x560   :  { %682 = vmatmul.msk.f32.gmra.mxu2 %vm46_vm0, %v381_v53 }
 0x567   :  { %v382_v54 = vpop.trf.xlu2 }
 0x568   :  { %683 = vmatmul.msk.f32.gmra.mxu2 %vm46_vm0, %v382_v54 }
 0x56f   :  { %v383_v55 = vpop.trf.xlu2 }
 0x570   :  { %684 = vmatmul.msk.f32.gmra.mxu2 %vm46_vm0, %v383_v55 }
 0x577   :  { %v384_v56 = vpop.trf.xlu2 }
 0x578   :  { %685 = vmatmul.msk.f32.gmra.mxu2 %vm46_vm0, %v384_v56 }
 0x57d   :  { %v450_v58 = vpop.f32.mrf.mxu0 }
 0x57e   :  { %v498_v11 = vmul.f32 %v450_v58, %v450_v58 }
 0x581   :  { %s929_s1 = spop %693 }
 0x585   :  { %v453_v0 = vpop.f32.mrf.mxu0 }
 0x586   :  { %v499_v10 = vmul.f32 %v453_v0, %v453_v0 }
 0x588   :  { %v514_v15 = vadd.f32 %v499_v10, %v498_v11 }
 0x58d   :  { %v456_v3 = vpop.f32.mrf.mxu0 }
 0x58e   :  { %v500_v12 = vmul.f32 %v456_v3, %v456_v3 }
 0x590   :  { %v515_v18 = vadd.f32 %v514_v15, %v500_v12 }
 0x595   :  { %v459_v7 = vpop.f32.mrf.mxu0 }
 0x596   :  { %v501_v16 = vmul.f32 %v459_v7, %v459_v7 }
 0x598   :  { %v516_v20 = vadd.f32 %v515_v18, %v501_v16 }
 0x59d   :  { %v462_v13 = vpop.f32.mrf.mxu0 }
 0x59e   :  { %v502_v19 = vmul.f32 %v462_v13, %v462_v13 }
 0x5a0   :  { %v517_v22 = vadd.f32 %v516_v20, %v502_v19 }
 0x5a5   :  { %v465_v1 = vpop.f32.mrf.mxu1 }
 0x5a6   :  { %v503_v21 = vmul.f32 %v465_v1, %v465_v1 }
 0x5a8   :  { %v518_v24 = vadd.f32 %v517_v22, %v503_v21 }
 0x5ad   :  { %v468_v5 = vpop.f32.mrf.mxu1 }
 0x5ae   :  { %v504_v23 = vmul.f32 %v468_v5, %v468_v5 }
 0x5b0   :  { %v519_v28 = vadd.f32 %v518_v24, %v504_v23 }
 0x5b5   :  { %v471_v8 = vpop.f32.mrf.mxu1 }
 0x5b6   :  { %v505_v25 = vmul.f32 %v471_v8, %v471_v8 }
 0x5b8   :  { %v327_v57 = vpop.xlane.xlu1 %326  ;;  %v520_v30 = vadd.f32 %v519_v28, %v505_v25 }
 0x5b9   :  { %v328_v59 = vrot.slane %v327_v57, 4 }
 0x5bb   :  { %v329_v60 = vadd.f32 %v328_v59, %v327_v57 }
 0x5bd   :  { %v330_v61 = vrot.slane %v329_v60, 2  ;;  %v474_v14 = vpop.f32.mrf.mxu1 }
 0x5be   :  { %v506_v29 = vmul.f32 %v474_v14, %v474_v14 }
 0x5bf   :  { %v331_v62 = vadd.f32 %v330_v61, %v329_v60 }
 0x5c0   :  { %v521_v4 = vadd.f32 %v520_v30, %v506_v29 }
 0x5c1   :  { %v332_v63 = vrot.slane %v331_v62, 1 }
 0x5c3   :  { %v333_v2 = vadd.f32 %v332_v63, %v331_v62 }
 0x5c5   :  { %695 = vpush %v333_v2  ;;  %v477_v26 = vpop.f32.mrf.mxu1  ;;  %v556_v2 = vpop.xlane.xlu1 %555 }
 0x5c6   :  { %v507_v31 = vmul.f32 %v477_v26, %v477_v26  ;;  %v557_v5 = vrot.slane %v556_v2, 4 }
 0x5c8   :  { %v522_v33 = vadd.f32 %v521_v4, %v507_v31 }
 0x5d3   :  { %v480_v6 = vpop.f32.mrf.mxu2 }
 0x5d4   :  { %v508_v32 = vmul.f32 %v480_v6, %v480_v6  ;;  %v558_v6 = vadd.f32 %v557_v5, %v556_v2 }
 0x5d6   :  { %v523_v36 = vadd.f32 %v522_v33, %v508_v32 }
 0x5db   :  { %v483_v9 = vpop.f32.mrf.mxu2 }
 0x5dc   :  { %v509_v34 = vmul.f32 %v483_v9, %v483_v9  ;;  %v559_v9 = vrot.slane %v558_v6, 2 }
 0x5de   :  { %v524_v38 = vadd.f32 %v523_v36, %v509_v34  ;;  %v560_v12 = vadd.f32 %v559_v9, %v558_v6 }
 0x5e0   :  { %v561_v15 = vrot.slane %v560_v12, 1 }
 0x5e2   :  { %v562_v20 = vadd.f32 %v561_v15, %v560_v12 }
 0x5e3   :  { %v486_v17 = vpop.f32.mrf.mxu2 }
 0x5e4   :  { %v510_v37 = vmul.f32 %v486_v17, %v486_v17 }
 0x5e6   :  { %v525_v41 = vadd.f32 %v524_v38, %v510_v37 }
 0x5eb   :  { %v489_v27 = vpop.f32.mrf.mxu2 }
 0x5ec   :  { %v511_v39 = vmul.f32 %v489_v27, %v489_v27 }
 0x5ee   :  { %v526_v43 = vadd.f32 %v525_v41, %v511_v39 }
 0x5f3   :  { %v492_v35 = vpop.f32.mrf.mxu2 }
 0x5f4   :  { %v512_v42 = vmul.f32 %v492_v35, %v492_v35 }
 0x5f6   :  { %s696_s30 = spop %695  ;;  %v527_v45 = vadd.f32 %v526_v43, %v512_v42 }
 0x5f7   :  { %v335_v40 = vstv %s696_s30 }
 0x5f8   :  { %730 = vrcp.f32 %v335_v40  ;;  %v347_v50 = vand.u32 2147483648, %v335_v40  ;;  %vm341_vm5 = vweird.f32 %v335_v40  ;;  %v345_v52 = vand.u32 2147483647, %v335_v40 }
 0x5fa   :  { %v348_v54 = vor.u32 1.1754944e-38, %v347_v50  ;;  %vm346_vm8 = vcmp.eq.f32.partialorder %v345_v52, 8.507059e+37 }
 0x5fb   :  { %v495_v44 = vpop.f32.mrf.mxu2 }
 0x5fc   :  { %v513_v46 = vmul.f32 %v495_v44, %v495_v44 }
 0x5fe   :  { %v731_v47 = vpop.eup %730  ;;  %v528_v48 = vadd.f32 %v527_v45, %v513_v46 }
 0x5ff   :  { %v337_v49 = vmul.f32 %v731_v47, %v335_v40  ;;  %vm342_vm6 = vweird.f32 %v731_v47 }
 0x600   :  { %529 = vadd.xlane.f32.xlu0 %v528_v48  ;;  %vm343_vm7 = vmor %vm341_vm5, %vm342_vm6 }
 0x601   :  { %v338_v51 = vsub.f32 1.0, %v337_v49 }
 0x603   :  { %v339_v53 = vmul.f32 %v731_v47, %v338_v51 }
 0x605   :  { %v340_v55 = vadd.f32 %v731_v47, %v339_v53 }
 0x607   :  { %v344_v56 = vsel %vm343_vm7, %v731_v47, %v340_v55 }
 0x608   :  { %v349_v57 = vsel %vm346_vm8, %v348_v54, %v344_v56 }
 0x609   :  { %697 = vpush %v349_v57 }
 0x63a   :  { %s698_s6 = spop %697 }
 0x63b   :  { %s351_s7 = smul.f32 %s698_s6, %s929_s1 }
 0x63d   :  { %s352_s8 = ssub.f32 0.0, %s351_s7 }
 0x63f   :  { %v599_v58 = vstv %s352_s8 }
 0x640   :  { %601 = vst.msk [vmem:[#allocation6] sm:$0x1] %vm600_vm9, %v599_v58 }
 0x641   :  { %627 = dma.vmem_to_hbm [thread:$0]  %s623_s12, 16, %s625_s15, [#allocation7]  }
 0x673   :  { %v530_v59 = vpop.xlane.xlu0 %529 }
 0x674   :  { %v531_v60 = vrot.slane %v530_v59, 4 }
 0x676   :  { %v532_v61 = vadd.f32 %v531_v60, %v530_v59 }
 0x678   :  { %v533_v62 = vrot.slane %v532_v61, 2 }
 0x67a   :  { %v534_v63 = vadd.f32 %v533_v62, %v532_v61 }
 0x67c   :  { %v535_v0 = vrot.slane %v534_v63, 1 }
 0x67e   :  { %v536_v1 = vadd.f32 %v535_v0, %v534_v63 }
 0x680   :  { %699 = vpush %v536_v1 }
 0x6b1   :  { %s700_s9 = spop %699 }
 0x6b2   :  { %v538_v3 = vstv %s700_s9 }
 0x6b3   :  { %732 = vrsqrt.f32 %v538_v3  ;;  %vm546_vm10 = vcmp.eq.f32.partialorder %v538_v3, inf  ;;  %v549_v17 = vand.u32 2147483648, %v538_v3  ;;  %vm548_vm11 = vcmp.eq.f32.partialorder %v538_v3, 0.0 }
 0x6b9   :  { %v733_v7 = vpop.eup %732 }
 0x6ba   :  { %v540_v8 = vmul.f32 %v733_v7, %v538_v3 }
 0x6bc   :  { %v541_v10 = vmul.f32 %v733_v7, %v540_v8 }
 0x6be   :  { %v542_v11 = vmul.f32 0.5, %v541_v10 }
 0x6c0   :  { %v543_v13 = vsub.f32 1.5, %v542_v11 }
 0x6c2   :  { %v544_v14 = vmul.f32 %v733_v7, %v543_v13 }
 0x6c4   :  { %v545_v16 = vmul.f32 %v544_v14, %v538_v3 }
 0x6c6   :  { %v547_v18 = vsel %vm546_vm10, %v538_v3, %v545_v16 }
 0x6c7   :  { %v550_v19 = vsel %vm548_vm11, %v549_v17, %v547_v18 }
 0x6c8   :  { %701 = vpush %v550_v19 }
 0x6c9   :  { %703 = vpush %v562_v20 }
 0x6f9   :  { %s702_s10 = spop %701 }
 0x6fa   :  { %v564_v21 = vstv %s702_s10  ;;  %s704_s21 = spop %703 }
 0x6fb   :  { %734 = vrcp.f32 %v564_v21  ;;  %v576_v25 = vand.u32 2147483648, %v564_v21  ;;  %v574_v27 = vand.u32 2147483647, %v564_v21  ;;  %vm570_vm13 = vweird.f32 %v564_v21 }
 0x6fd   :  { %v577_v29 = vor.u32 1.1754944e-38, %v576_v25  ;;  %vm575_vm15 = vcmp.eq.f32.partialorder %v574_v27, 8.507059e+37 }
 0x701   :  { %v735_v22 = vpop.eup %734 }
 0x702   :  { %v566_v23 = vmul.f32 %v735_v22, %v564_v21  ;;  %vm571_vm12 = vweird.f32 %v735_v22 }
 0x703   :  { %vm572_vm14 = vmor %vm570_vm13, %vm571_vm12 }
 0x704   :  { %v567_v24 = vsub.f32 1.0, %v566_v23 }
 0x706   :  { %v568_v26 = vmul.f32 %v735_v22, %v567_v24 }
 0x708   :  { %v569_v28 = vadd.f32 %v735_v22, %v568_v26 }
 0x70a   :  { %v573_v30 = vsel %vm572_vm14, %v735_v22, %v569_v28 }
 0x70b   :  { %v578_v31 = vsel %vm575_vm15, %v577_v29, %v573_v30 }
 0x70c   :  { %705 = vpush %v578_v31 }
 0x73d   :  { %s706_s22 = spop %705 }
 0x73e   :  { %s580_s25 = smul.f32 %s706_s22, %s704_s21 }
 0x740   :  { %s581_s26 = smul.f32 2.0, %s580_s25 }
 0x742   :  { %s582_s4 = smul.f32 0.5, %s581_s26 }
 0x744   :  { %s583_s27 = ssub.f32 2.0, %s582_s4 }
 0x746   :  { %s584_s2 = smax.f32 %s846_s28, %s583_s27 }
 0x747   :  { %v585_v4 = vstv %s584_s2 }
 0x748   :  { %736 = vrsqrt.f32 %v585_v4  ;;  %vm593_vm0 = vcmp.eq.f32.partialorder %v585_v4, inf  ;;  %v596_v39 = vand.u32 2147483648, %v585_v4  ;;  %vm595_vm1 = vcmp.eq.f32.partialorder %v585_v4, 0.0 }
 0x74e   :  { %v737_v32 = vpop.eup %736 }
 0x74f   :  { %v587_v33 = vmul.f32 %v737_v32, %v585_v4 }
 0x751   :  { %v588_v34 = vmul.f32 %v737_v32, %v587_v33 }
 0x753   :  { %v589_v35 = vmul.f32 0.5, %v588_v34 }
 0x755   :  { %v590_v36 = vsub.f32 1.5, %v589_v35 }
 0x757   :  { %v591_v37 = vmul.f32 %v737_v32, %v590_v36 }
 0x759   :  { %v592_v38 = vmul.f32 %v591_v37, %v585_v4 }
 0x75b   :  { %v594_v40 = vsel %vm593_vm0, %v585_v4, %v592_v38 }
 0x75c   :  { %v597_v41 = vsel %vm595_vm1, %v596_v39, %v594_v40 }
 0x75d   :  { %707 = vpush %v597_v41 }
 0x78e   :  { %s708_s1 = spop %707 }
 0x78f   :  { %v602_v42 = vstv %s708_s1 }
 0x790   :  { %603 = vst.msk [vmem:[#allocation8] sm:$0x1] %vm600_vm9, %v602_v42 }
 0x791   :  { %638 = dma.vmem_to_hbm [thread:$0]  %s634_s23, 16, %s636_s0, [#allocation7]  }
 0x792   :  { %836 = dma.done.wait [#allocation4], 256  }
 0x793   :  { %837 = vsyncadd [#allocation4], 4294967040 }
 0x794   :  { %838 = dma.done.wait [#allocation7], 32  }
 0x795   :  { %839 = vsyncadd [#allocation7], 4294967264 }
 0x796   :  { %651 = vsyncpa [#allocation3], 1 }
 0x797   :  { %652 = vsyncpa [#allocation4], 1 }
 0x798   :  { %653 = vsyncpa [#allocation7], 1 }

</bundles_post_ra>
